<compile_context>
chip_gen: v5e
topology: v5e:2x2
jax: 0.10.0
libtpu: 0.0.40
codegen_flags: <defaults>
</compile_context>

<pallas_src>
import functools

import jax
import jax.numpy as jnp
from jax.experimental import pallas as pl
from jax.experimental.pallas import tpu as pltpu


# ----------------------------------------------------------------------------
# Tile-size helpers (TPU (8, 128) alignment aware)
# ----------------------------------------------------------------------------

def _pick_divisor_tile(total, cap, align=8):
    """Divisor of `total` that keeps blocks TPU-aligned.

    Prefer the largest multiple of `align` dividing `total` that is <= cap; if none,
    take the smallest aligned divisor; fall back to `total` (block == full dim is always
    legal for the (8,128) constraint).
    """
    if total <= cap:
        return total
    start = cap - cap % align
    for d in range(start, 0, -align):
        if total % d == 0:
            return d
    d = align
    while d <= total:
        if total % d == 0:
            return d
        d += align
    return total


def _pick_batch_tile(batch, tile_s, target_rows=256):
    """Fold enough batch rows per MLM grid step to fill the MXU M dimension."""
    cap = max(1, target_rows // max(tile_s, 1))
    return _pick_divisor_tile(batch, cap)


# ----------------------------------------------------------------------------
# Kernel 1: fused ITA branch (rec proj + text proj + symmetric contrastive CE),
#           tiled over row tiles with online column logsumexp.
# ----------------------------------------------------------------------------

def _ita_kernel(rec_ref, text_ref, rw_ref, rb_ref, tw_ref, tb_ref, o_ref,
                temb_ref, colm_ref, cols_ref, accr_ref, accd_ref,
                *, inv_temp, tile_b, total_b, mxu_dtype):
    i = pl.program_id(0)
    n_tiles = pl.num_programs(0)

    @pl.when(i == 0)
    def _():
        # Project ALL text rows once; cache in VMEM (already in MXU dtype) for every tile.
        t_emb = jnp.dot(text_ref[...].astype(mxu_dtype), tw_ref[...].astype(mxu_dtype),
                        preferred_element_type=jnp.float32) + tb_ref[...]
        temb_ref[...] = t_emb.astype(temb_ref.dtype)
        colm_ref[...] = jnp.full(colm_ref.shape, -jnp.inf, jnp.float32)
        cols_ref[...] = jnp.zeros_like(cols_ref)
        accr_ref[...] = jnp.zeros_like(accr_ref)
        accd_ref[...] = jnp.zeros_like(accd_ref)

    # Projection head for this row tile (Linear stand-in). f32 accumulation on the MXU.
    rec_emb = jnp.dot(rec_ref[...].astype(mxu_dtype), rw_ref[...].astype(mxu_dtype),
                      preferred_element_type=jnp.float32) + rb_ref[...]        # (tile_b, P)

    # logits[i, j] = <rec_emb[i], text_emb[j]> / T ; contract LAST dims (no transpose).
    # NOTE: the PyTorch reference does NOT L2-normalize embeddings, so neither do we.
    logits = jax.lax.dot_general(
        rec_emb.astype(mxu_dtype), temb_ref[...],
        dimension_numbers=(((1,), (1,)), ((), ())),
        preferred_element_type=jnp.float32) * inv_temp                         # (tile_b, B)

    # Diagonal (shared by both CE directions) -- computed ONCE per tile.
    row_ids = jax.lax.broadcasted_iota(jnp.int32, logits.shape, 0) + i * tile_b
    col_ids = jax.lax.broadcasted_iota(jnp.int32, logits.shape, 1)
    diag = jnp.sum(jnp.where(row_ids == col_ids, logits, 0.0), axis=1, keepdims=True)

    # Row-wise CE (rec -> text): accumulate sum of LSE and of the diagonal.
    m_r = jnp.max(logits, axis=1, keepdims=True)
    lse_r = m_r + jnp.log(jnp.sum(jnp.exp(logits - m_r), axis=1, keepdims=True))
    accr_ref[...] += jnp.sum(lse_r, keepdims=True)
    accd_ref[...] += jnp.sum(diag, keepdims=True)

    # Column-wise CE (text -> rec): online max/sum across row tiles in (1, B) scratch.
    t_m = jnp.max(logits, axis=0, keepdims=True)
    new_m = jnp.maximum(colm_ref[...], t_m)
    cols_ref[...] = (cols_ref[...] * jnp.exp(colm_ref[...] - new_m)
                     + jnp.sum(jnp.exp(logits - new_m), axis=0, keepdims=True))
    colm_ref[...] = new_m

    @pl.when(i == n_tiles - 1)
    def _():
        lse_c_sum = jnp.sum(colm_ref[...] + jnp.log(cols_ref[...]), keepdims=True)
        inv_n = jnp.float32(1.0 / total_b)
        # 0.5 * (mean(lse_r) + mean(lse_c) - 2 * mean(diag))
        loss = 0.5 * ((accr_ref[...] - accd_ref[...])
                      + (lse_c_sum - accd_ref[...])) * inv_n
        o_ref[...] = loss


def fused_ita_loss(rec_features, text_features, rec_w, rec_b, text_w, text_b,
                   *, temperature, tile_b=None, mxu_dtype=jnp.bfloat16):
    B, RD = rec_features.shape
    TD = text_features.shape[1]
    P = rec_w.shape[1]
    if tile_b is None:
        tile_b = _pick_divisor_tile(B, 256)
    assert B % tile_b == 0 and (tile_b % 8 == 0 or tile_b == B)
    n_tiles = B // tile_b

    out = pl.pallas_call(
        functools.partial(_ita_kernel, inv_temp=1.0 / float(temperature),
                          tile_b=tile_b, total_b=B, mxu_dtype=mxu_dtype),
        out_shape=jax.ShapeDtypeStruct((1, 1), jnp.float32),
        grid=(n_tiles,),
        in_specs=[
            pl.BlockSpec((tile_b, RD), lambda i: (i, 0)),   # rec_features row tile
            pl.BlockSpec((B, TD), lambda i: (0, 0)),        # text_features (full, constant)
            pl.BlockSpec((RD, P), lambda i: (0, 0)),
            pl.BlockSpec((1, P), lambda i: (0, 0)),
            pl.BlockSpec((TD, P), lambda i: (0, 0)),
            pl.BlockSpec((1, P), lambda i: (0, 0)),
        ],
        out_specs=pl.BlockSpec((1, 1), lambda i: (0, 0)),
        scratch_shapes=[
            pltpu.VMEM((B, P), mxu_dtype),      # cached text embeddings
            pltpu.VMEM((1, B), jnp.float32),    # online column max
            pltpu.VMEM((1, B), jnp.float32),    # online column sum
            pltpu.VMEM((1, 1), jnp.float32),    # sum of row LSE
            pltpu.VMEM((1, 1), jnp.float32),    # sum of diagonal
        ],
        compiler_params=pltpu.CompilerParams(
            dimension_semantics=("arbitrary",)),   # column stats accumulate across row tiles
    )(rec_features, text_features, rec_w, rec_b.reshape(1, P),
      text_w, text_b.reshape(1, P))
    return out[0, 0]


# ----------------------------------------------------------------------------
# Kernel 2: fused MFM feature path (Simple_Attention + split-weight feat_encoder),
#           gridded over batch tiles ("parallel" -> both v7x TensorCores).
# ----------------------------------------------------------------------------

def _mfm_feat_kernel(mrec_ref, seq_ref, aw_ref, ab_ref, g_ref, beta_ref,
                     fw_rec_ref, fw_tmp_ref, fb_ref, o_ref, *, mxu_dtype):
    mrec = mrec_ref[...]                                                      # (bt, REC_DIM)

    # Simple_Attention.linear_s: Linear -> LayerNorm (eps = 1e-5, PyTorch default).
    q = jnp.dot(mrec.astype(mxu_dtype), aw_ref[...].astype(mxu_dtype),
                preferred_element_type=jnp.float32) + ab_ref[...]
    mu = jnp.mean(q, axis=-1, keepdims=True)
    var = jnp.mean((q - mu) ** 2, axis=-1, keepdims=True)
    q = (q - mu) * jax.lax.rsqrt(var + 1e-5) * g_ref[...] + beta_ref[...]     # (bt, Dk)

    kv = seq_ref[...]                                                         # (bt, S, Dk)
    # Attention with a single query per row: VPU multiply + reduce (no M=1 MXU passes,
    # no unit-dim insert/squeeze layout copies).
    scores = jnp.sum(q[:, None, :] * kv, axis=-1)                             # (bt, S)
    m = jnp.max(scores, axis=-1, keepdims=True)
    e = jnp.exp(scores - m)
    p = e * pl.reciprocal(jnp.sum(e, axis=-1, keepdims=True), approx=True)    # softmax
    ctx = jnp.sum(p[:, :, None] * kv, axis=1)                                 # (bt, Dk)

    # feat_encoder(concat([mask_rec, ctx])) == mask_rec @ W_rec + ctx @ W_ctx (split weights)
    enc = (jnp.dot(mrec.astype(mxu_dtype), fw_rec_ref[...].astype(mxu_dtype),
                   preferred_element_type=jnp.float32)
           + jnp.dot(ctx.astype(mxu_dtype), fw_tmp_ref[...].astype(mxu_dtype),
                     preferred_element_type=jnp.float32)
           + fb_ref[...])
    o_ref[...] = enc.astype(o_ref.dtype)


def fused_mfm_features(mask_rec_features, text_seq_features,
                       attn_w, attn_b, ln_g, ln_b,
                       feat_w_rec, feat_w_tmp, feat_b,
                       *, tile_b=None, mxu_dtype=jnp.bfloat16):
    B, RD = mask_rec_features.shape
    S, Dk = text_seq_features.shape[1], text_seq_features.shape[2]
    F = feat_w_rec.shape[1]
    if tile_b is None:
        tile_b = _pick_divisor_tile(B, 256)
    assert B % tile_b == 0 and (tile_b % 8 == 0 or tile_b == B)
    n_bt = B // tile_b

    return pl.pallas_call(
        functools.partial(_mfm_feat_kernel, mxu_dtype=mxu_dtype),
        out_shape=jax.ShapeDtypeStruct((B, F), jnp.float32),
        grid=(n_bt,),
        in_specs=[
            pl.BlockSpec((tile_b, RD), lambda b: (b, 0)),
            pl.BlockSpec((tile_b, S, Dk), lambda b: (b, 0, 0)),
            pl.BlockSpec((RD, Dk), lambda b: (0, 0)),
            pl.BlockSpec((1, Dk), lambda b: (0, 0)),
            pl.BlockSpec((1, Dk), lambda b: (0, 0)),
            pl.BlockSpec((1, Dk), lambda b: (0, 0)),
            pl.BlockSpec((RD, F), lambda b: (0, 0)),
            pl.BlockSpec((Dk, F), lambda b: (0, 0)),
            pl.BlockSpec((1, F), lambda b: (0, 0)),
        ],
        out_specs=pl.BlockSpec((tile_b, F), lambda b: (b, 0)),
        compiler_params=pltpu.CompilerParams(
            dimension_semantics=("parallel",)),     # batch tiles shard across v7x TCs
    )(mask_rec_features, text_seq_features,
      attn_w, attn_b.reshape(1, Dk), ln_g.reshape(1, Dk), ln_b.reshape(1, Dk),
      feat_w_rec, feat_w_tmp, feat_b.reshape(1, F))


# ----------------------------------------------------------------------------
# Kernel 3: fused MLM prediction + cross-entropy,
#           tiled over (batch-tile, seq-tile, vocab-tile) with online logsumexp.
# ----------------------------------------------------------------------------

def _mlm_ce_kernel(mtf_ref, rec_ref, lbl_ref,
                   w1t_ref, w1r_ref, b1_ref, w2_ref, b2_ref,
                   loss_ref, rec_h_ref, h_ref, m_ref, s_ref, t_ref,
                   *, tile_v, mxu_dtype):
    j = pl.program_id(1)
    v = pl.program_id(2)
    n_v = pl.num_programs(2)
    bt, tile_s, _ = mtf_ref.shape
    rows = bt * tile_s

    # Per batch tile (once): zero the per-row loss output and compute the rec-side
    # contribution to the first Linear (identical for every token of a batch row).
    @pl.when(jnp.logical_and(j == 0, v == 0))
    def _():
        loss_ref[...] = jnp.zeros_like(loss_ref)
        rec = rec_ref[...].reshape(bt, -1)                                    # (bt, RD)
        rec_h_ref[...] = jnp.dot(rec.astype(mxu_dtype), w1r_ref[...].astype(mxu_dtype),
                                 preferred_element_type=jnp.float32)

    # Per (batch tile, seq tile) (once): hidden activations cached in scratch so every
    # vocab tile reuses them; running logsumexp state initialized.
    @pl.when(v == 0)
    def _():
        mtf = mtf_ref[...].reshape(rows, -1)                                  # (rows, TD)
        h_text = jnp.dot(mtf.astype(mxu_dtype), w1t_ref[...].astype(mxu_dtype),
                         preferred_element_type=jnp.float32)                  # (rows, H)
        h = jnp.tanh(h_text.reshape(bt, tile_s, -1)
                     + rec_h_ref[...][:, None, :] + b1_ref[...])
        h_ref[...] = h.reshape(rows, -1).astype(h_ref.dtype)
        m_ref[...] = jnp.full(m_ref.shape, -jnp.inf, jnp.float32)
        s_ref[...] = jnp.zeros_like(s_ref)
        t_ref[...] = jnp.zeros_like(t_ref)

    # One vocab tile of logits (never leaves VMEM); online max/sum/target update.
    logits = jnp.dot(h_ref[...], w2_ref[...].astype(mxu_dtype),
                     preferred_element_type=jnp.float32) + b2_ref[...]        # (rows, tile_v)

    lbl = lbl_ref[...].reshape(rows, 1)                                       # int32 labels
    col = jax.lax.broadcasted_iota(jnp.int32, logits.shape, 1) + v * tile_v
    t_ref[...] += jnp.sum(jnp.where(col == lbl, logits, 0.0), axis=-1, keepdims=True)

    tile_m = jnp.max(logits, axis=-1, keepdims=True)
    new_m = jnp.maximum(m_ref[...], tile_m)
    s_ref[...] = (s_ref[...] * jnp.exp(m_ref[...] - new_m)
                  + jnp.sum(jnp.exp(logits - new_m), axis=-1, keepdims=True))
    m_ref[...] = new_m

    @pl.when(v == n_v - 1)
    def _():
        lse = m_ref[...] + jnp.log(s_ref[...])
        # nn.CrossEntropyLoss default ignore_index=-100: mask out negative labels.
        valid = lbl >= 0
        tok = jnp.where(valid, lse - t_ref[...], 0.0)                         # (rows, 1)
        loss_ref[...] += jnp.sum(tok.reshape(bt, tile_s), axis=1, keepdims=True)


def fused_mlm_loss(mask_text_features, rec_features, labels,
                   w1_text, w1_rec, b1, w2, b2,
                   *, tile_s=None, tile_v=None, batch_tile=None, mxu_dtype=jnp.bfloat16):
    B, S, TD = mask_text_features.shape
    RD = rec_features.shape[-1]
    H = w1_text.shape[1]
    V = w2.shape[1]

    if tile_s is None:
        tile_s = _pick_divisor_tile(S, 128)
    assert S % tile_s == 0 and (tile_s % 8 == 0 or tile_s == S)
    if tile_v is None:
        # Stream the vocab in lane-aligned tiles: keeps the live (rows, tile_v) logits
        # plus double-buffered (H, tile_v) W2 blocks well under v7x's 64 MiB VMEM.
        tile_v = _pick_divisor_tile(V, 1024, align=128)
    assert V % tile_v == 0 and (tile_v % 128 == 0 or tile_v == V)
    if batch_tile is None:
        batch_tile = _pick_batch_tile(B, tile_s)
    assert B % batch_tile == 0 and (batch_tile % 8 == 0 or batch_tile == B)

    n_b, n_s, n_v = B // batch_tile, S // tile_s, V // tile_v
    rows = batch_tile * tile_s

    rec3 = rec_features.reshape(B, 1, RD)
    lbl3 = labels.astype(jnp.int32).reshape(B, S, 1)

    partials = pl.pallas_call(
        functools.partial(_mlm_ce_kernel, tile_v=tile_v, mxu_dtype=mxu_dtype),
        out_shape=jax.ShapeDtypeStruct((B, 1), jnp.float32),
        grid=(n_b, n_s, n_v),
        in_specs=[
            pl.BlockSpec((batch_tile, tile_s, TD), lambda b, j, v: (b, j, 0)),
            pl.BlockSpec((batch_tile, 1, RD), lambda b, j, v: (b, 0, 0)),
            pl.BlockSpec((batch_tile, tile_s, 1), lambda b, j, v: (b, j, 0)),
            pl.BlockSpec((TD, H), lambda b, j, v: (0, 0)),       # constant-index weights:
            pl.BlockSpec((RD, H), lambda b, j, v: (0, 0)),       # no re-DMA across j / v
            pl.BlockSpec((1, H), lambda b, j, v: (0, 0)),
            pl.BlockSpec((H, tile_v), lambda b, j, v: (0, v)),   # W2 streamed over vocab
            pl.BlockSpec((1, tile_v), lambda b, j, v: (0, v)),
        ],
        out_specs=pl.BlockSpec((batch_tile, 1), lambda b, j, v: (b, 0)),
        scratch_shapes=[
            pltpu.VMEM((batch_tile, H), jnp.float32),   # rec-side hidden (per batch row)
            pltpu.VMEM((rows, H), mxu_dtype),           # cached tanh activations
            pltpu.VMEM((rows, 1), jnp.float32),         # running max
            pltpu.VMEM((rows, 1), jnp.float32),         # running sum(exp)
            pltpu.VMEM((rows, 1), jnp.float32),         # target logit accumulator
        ],
        compiler_params=pltpu.CompilerParams(
            dimension_semantics=("parallel", "arbitrary", "arbitrary")),
    )(mask_text_features, rec3, lbl3, w1_text, w1_rec,
      b1.reshape(1, H), w2, b2.reshape(1, V))

    # Mean over VALID tokens (PyTorch CrossEntropyLoss default ignore_index=-100).
    n_valid = jnp.sum((labels >= 0).astype(jnp.float32))
    return jnp.sum(partials) / jnp.maximum(n_valid, 1.0)


# ----------------------------------------------------------------------------
# MaskCTR forward (glue in plain JAX, hot paths in fused Pallas kernels)
# ----------------------------------------------------------------------------

def maskctr_forward(params, batch, *, temperature, num_fields, proj_size,
                    use_mfm=True, use_mlm=True, mxu_dtype=jnp.bfloat16,
                    ita_tile_b=None, mfm_tile_b=None,
                    mlm_tile_s=None, mlm_tile_v=None, mlm_batch_tile=None):
    rec_features = batch["rec_features"]            # (B, rec_dim)  <- rec_encoder output
    text_features = batch["text_features"]          # (B, text_dim) <- text_encoder output

    # --- contrastive (ITA) loss ------------------------------------------------------
    loss_ita = fused_ita_loss(
        rec_features, text_features,
        params["rec_proj_w"], params["rec_proj_b"],
        params["text_proj_w"], params["text_proj_b"],
        temperature=temperature, tile_b=ita_tile_b, mxu_dtype=mxu_dtype)
    total_loss = loss_ita
    return_list = [loss_ita]

    # --- MFM branch (feature path only; criterion undefined) --------------------------
    if use_mfm:
        enc_output = fused_mfm_features(
            batch["mask_rec_features"], batch["text_seq_features"],
            params["attn_w"], params["attn_b"],
            params["attn_ln_g"], params["attn_ln_b"],
            params["feat_enc_w_rec"], params["feat_enc_w_tmp"], params["feat_enc_b"],
            tile_b=mfm_tile_b, mxu_dtype=mxu_dtype)
        B = enc_output.shape[0]
        enc_output = enc_output.reshape(B, num_fields, proj_size)
        selected_output = jnp.take_along_axis(
            enc_output, batch["mask_rec_index"][:, :, None].astype(jnp.int32), axis=1)
        # TODO(synk): IndexLinear criterion (sampled softmax over feat_count) is undefined
        # in the reference; mfm_loss cannot be reproduced, so it contributes 0 here.
        mfm_loss = jnp.float32(0.0) * jnp.sum(selected_output)
        total_loss = total_loss + mfm_loss
        return_list.append(mfm_loss)

    # --- MLM branch: fused prediction + cross-entropy ---------------------------------
    if use_mlm:
        mlm_loss = fused_mlm_loss(
            batch["mask_text_features"], rec_features, batch["mask_text_label"],
            params["pred_w1_text"], params["pred_w1_rec"], params["pred_b1"],
            params["pred_w2"], params["pred_b2"],
            tile_s=mlm_tile_s, tile_v=mlm_tile_v, batch_tile=mlm_batch_tile,
            mxu_dtype=mxu_dtype)
        total_loss = total_loss + mlm_loss
        return_list.append(mlm_loss)

    return total_loss, return_list


# ----------------------------------------------------------------------------
# main
# ----------------------------------------------------------------------------

if __name__ == "__main__":
    # Small, self-consistent shapes (lane-dense where it matters: PROJ_DIM=128, VOCAB=256).
    B = 8                # batch
    REC_DIM = 32         # rec_embedding_dim
    TEXT_DIM = 32        # text_embedding_dim
    PROJ_DIM = 128       # projection_dim (hardcoded in MaskCTR.__init__)
    S = 8                # text sequence length
    VOCAB = 256          # text_tokenizer_num
    NUM_FIELDS = 4       # struct_field_size
    PROJ_SIZE = 32       # config['proj_size'] (hardcoded)
    N_MASKED = 2
    TEMPERATURE = 1.0

    key = jax.random.PRNGKey(0)
    ks = jax.random.split(key, 20)

    def w(k, shape, scale=0.02):
        return (scale * jax.random.normal(k, shape)).astype(jnp.float32)

    params = {
        # projection heads (stand-in Linear -> 128)
        "rec_proj_w": w(ks[0], (REC_DIM, PROJ_DIM)),
        "rec_proj_b": jnp.zeros((PROJ_DIM,), jnp.float32),
        "text_proj_w": w(ks[1], (TEXT_DIM, PROJ_DIM)),
        "text_proj_b": jnp.zeros((PROJ_DIM,), jnp.float32),
        # Simple_Attention: Linear(rec_dim -> text_dim) + LayerNorm(text_dim)
        "attn_w": w(ks[2], (REC_DIM, TEXT_DIM)),
        "attn_b": jnp.zeros((TEXT_DIM,), jnp.float32),
        "attn_ln_g": jnp.ones((TEXT_DIM,), jnp.float32),
        "attn_ln_b": jnp.zeros((TEXT_DIM,), jnp.float32),
        # feat_encoder: Linear(rec+text -> num_fields * proj_size), stored split
        "feat_enc_w_rec": w(ks[3], (REC_DIM, NUM_FIELDS * PROJ_SIZE)),
        "feat_enc_w_tmp": w(ks[4], (TEXT_DIM, NUM_FIELDS * PROJ_SIZE)),
        "feat_enc_b": jnp.zeros((NUM_FIELDS * PROJ_SIZE,), jnp.float32),
        # mlm_Prediction_Layer: Linear(text+rec -> text_dim) -> tanh -> Linear(text_dim -> vocab)
        "pred_w1_text": w(ks[5], (TEXT_DIM, TEXT_DIM)),
        "pred_w1_rec": w(ks[6], (REC_DIM, TEXT_DIM)),
        "pred_b1": jnp.zeros((TEXT_DIM,), jnp.float32),
        "pred_w2": w(ks[7], (TEXT_DIM, VOCAB)),
        "pred_b2": jnp.zeros((VOCAB,), jnp.float32),
    }

    labels = jax.random.randint(ks[15], (B, S), 0, VOCAB, jnp.int32)
    # Mark ~25% of positions as "unmasked" with -100 (standard MLM / CrossEntropyLoss ignore).
    ignore = jax.random.bernoulli(ks[17], 0.25, (B, S))
    labels = jnp.where(ignore, jnp.int32(-100), labels)

    batch = {
        "rec_features": jax.random.normal(ks[10], (B, REC_DIM), jnp.float32),
        "text_features": jax.random.normal(ks[11], (B, TEXT_DIM), jnp.float32),
        "text_seq_features": jax.random.normal(ks[12], (B, S, TEXT_DIM), jnp.float32),
        "mask_rec_features": jax.random.normal(ks[13], (B, REC_DIM), jnp.float32),
        "mask_text_features": jax.random.normal(ks[14], (B, S, TEXT_DIM), jnp.float32),
        "mask_text_label": labels,
        "mask_rec_index": jax.random.randint(ks[16], (B, N_MASKED), 0, NUM_FIELDS, jnp.int32),
    }

    total_loss, losses = maskctr_forward(
        params, batch,
        temperature=TEMPERATURE, num_fields=NUM_FIELDS, proj_size=PROJ_SIZE,
        use_mfm=True, use_mlm=True,
        mlm_tile_v=128)   # V=256 -> two vocab tiles: exercises the online-LSE streaming path

    jax.block_until_ready(total_loss)
    for l in losses:
        jax.block_until_ready(l)
        assert jnp.isfinite(l), "a loss component is not finite"
    assert jnp.isfinite(total_loss), "total loss is not finite"
    print("KERNEL_OK")
</pallas_src>

<mosaic_0001>
module attributes {stable_mosaic.version = 11 : i64} {
  func.func @_ita_kernel(%arg0: i32, %arg1: memref<8x32xf32, #tpu.memory_space<vmem>>, %arg2: memref<8x32xf32, #tpu.memory_space<vmem>>, %arg3: memref<32x128xf32, #tpu.memory_space<vmem>>, %arg4: memref<1x128xf32, #tpu.memory_space<vmem>>, %arg5: memref<32x128xf32, #tpu.memory_space<vmem>>, %arg6: memref<1x128xf32, #tpu.memory_space<vmem>>, %arg7: memref<1x1xf32, #tpu.memory_space<vmem>>, %arg8: memref<8x128xbf16, #tpu.memory_space<vmem>>, %arg9: memref<1x8xf32, #tpu.memory_space<vmem>>, %arg10: memref<1x8xf32, #tpu.memory_space<vmem>>, %arg11: memref<1x1xf32, #tpu.memory_space<vmem>>, %arg12: memref<1x1xf32, #tpu.memory_space<vmem>>) attributes {dimension_semantics = [#tpu.dimension_semantics<arbitrary>], iteration_bounds = array<i64: 1>, scalar_prefetch = 0 : i64, scratch_operands = 5 : i64, tpu.core_type = #tpu.core_type<tc>, window_params = [{transform_indices = @transform_0, window_bounds = array<i64: 8, 32>}, {pipeline_mode = #tpu.pipeline_mode<synchronous>, transform_indices = @transform_1, window_bounds = array<i64: 8, 32>}, {pipeline_mode = #tpu.pipeline_mode<synchronous>, transform_indices = @transform_2, window_bounds = array<i64: 32, 128>}, {pipeline_mode = #tpu.pipeline_mode<synchronous>, transform_indices = @transform_3, window_bounds = array<i64: 1, 128>}, {pipeline_mode = #tpu.pipeline_mode<synchronous>, transform_indices = @transform_4, window_bounds = array<i64: 32, 128>}, {pipeline_mode = #tpu.pipeline_mode<synchronous>, transform_indices = @transform_5, window_bounds = array<i64: 1, 128>}, {pipeline_mode = #tpu.pipeline_mode<synchronous>, transform_indices = @transform_6, window_bounds = array<i64: 1, 1>}]} {
    %c0_i32 = arith.constant 0 : i32
    %0 = arith.cmpi eq, %arg0, %c0_i32 : i32
    %1 = arith.extui %0 : i1 to i32
    %c0_i32_0 = arith.constant 0 : i32
    %2 = arith.cmpi ne, %1, %c0_i32_0 : i32
    scf.if %2 {
      %c0_38 = arith.constant 0 : index
      %c0_39 = arith.constant 0 : index
      %71 = vector.load %arg2[%c0_38, %c0_39] : memref<8x32xf32, #tpu.memory_space<vmem>>, vector<8x32xf32>
      %72 = arith.truncf %71 : vector<8x32xf32> to vector<8x32xbf16>
      %c0_40 = arith.constant 0 : index
      %c0_41 = arith.constant 0 : index
      %73 = vector.load %arg5[%c0_40, %c0_41] : memref<32x128xf32, #tpu.memory_space<vmem>>, vector<32x128xf32>
      %74 = arith.truncf %73 : vector<32x128xf32> to vector<32x128xbf16>
      %cst_42 = arith.constant dense<0.000000e+00> : vector<8x128xf32>
      %75 = tpu.matmul %72, %74, %cst_42 {dimension_numbers = #tpu.dot_dimension_numbers<[1], [0], [0], [1], [0, 0, 1, 1], [], []>} : vector<8x32xbf16>, vector<32x128xbf16>, vector<8x128xf32> -> vector<8x128xf32>
      %c0_43 = arith.constant 0 : index
      %c0_44 = arith.constant 0 : index
      %76 = vector.load %arg6[%c0_43, %c0_44] : memref<1x128xf32, #tpu.memory_space<vmem>>, vector<1x128xf32>
      %77 = vector.broadcast %76 : vector<1x128xf32> to vector<8x128xf32>
      %78 = arith.addf %75, %77 : vector<8x128xf32>
      %79 = arith.truncf %78 : vector<8x128xf32> to vector<8x128xbf16>
      %c0_45 = arith.constant 0 : index
      %c0_46 = arith.constant 0 : index
      %80 = vector.load %arg8[%c0_45, %c0_46] : memref<8x128xbf16, #tpu.memory_space<vmem>>, vector<8x128xbf16>
      tpu.vector_store %arg8[%c0_45, %c0_46], %79 {strides = array<i32>} : memref<8x128xbf16, #tpu.memory_space<vmem>>, vector<8x128xbf16>,
      %cst_47 = arith.constant 0xFF800000 : f32
      %81 = vector.broadcast %cst_47 : f32 to vector<1x8xf32>
      %c0_48 = arith.constant 0 : index
      %c0_49 = arith.constant 0 : index
      %82 = vector.load %arg9[%c0_48, %c0_49] : memref<1x8xf32, #tpu.memory_space<vmem>>, vector<1x8xf32>
      tpu.vector_store %arg9[%c0_48, %c0_49], %81 {strides = array<i32>} : memref<1x8xf32, #tpu.memory_space<vmem>>, vector<1x8xf32>,
      %cst_50 = arith.constant 0.000000e+00 : f32
      %83 = vector.broadcast %cst_50 : f32 to vector<1x8xf32>
      %c0_51 = arith.constant 0 : index
      %c0_52 = arith.constant 0 : index
      %84 = vector.load %arg10[%c0_51, %c0_52] : memref<1x8xf32, #tpu.memory_space<vmem>>, vector<1x8xf32>
      tpu.vector_store %arg10[%c0_51, %c0_52], %83 {strides = array<i32>} : memref<1x8xf32, #tpu.memory_space<vmem>>, vector<1x8xf32>,
      %cst_53 = arith.constant 0.000000e+00 : f32
      %85 = vector.broadcast %cst_53 : f32 to vector<1x1xf32>
      %c0_54 = arith.constant 0 : index
      %c0_55 = arith.constant 0 : index
      %86 = vector.load %arg11[%c0_54, %c0_55] : memref<1x1xf32, #tpu.memory_space<vmem>>, vector<1x1xf32>
      tpu.vector_store %arg11[%c0_54, %c0_55], %85 {strides = array<i32>} : memref<1x1xf32, #tpu.memory_space<vmem>>, vector<1x1xf32>,
      %cst_56 = arith.constant 0.000000e+00 : f32
      %87 = vector.broadcast %cst_56 : f32 to vector<1x1xf32>
      %c0_57 = arith.constant 0 : index
      %c0_58 = arith.constant 0 : index
      %88 = vector.load %arg12[%c0_57, %c0_58] : memref<1x1xf32, #tpu.memory_space<vmem>>, vector<1x1xf32>
      tpu.vector_store %arg12[%c0_57, %c0_58], %87 {strides = array<i32>} : memref<1x1xf32, #tpu.memory_space<vmem>>, vector<1x1xf32>,
    } else {
    }
    %c0 = arith.constant 0 : index
    %c0_1 = arith.constant 0 : index
    %3 = vector.load %arg1[%c0, %c0_1] : memref<8x32xf32, #tpu.memory_space<vmem>>, vector<8x32xf32>
    %4 = arith.truncf %3 : vector<8x32xf32> to vector<8x32xbf16>
    %c0_2 = arith.constant 0 : index
    %c0_3 = arith.constant 0 : index
    %5 = vector.load %arg3[%c0_2, %c0_3] : memref<32x128xf32, #tpu.memory_space<vmem>>, vector<32x128xf32>
    %6 = arith.truncf %5 : vector<32x128xf32> to vector<32x128xbf16>
    %cst = arith.constant dense<0.000000e+00> : vector<8x128xf32>
    %7 = tpu.matmul %4, %6, %cst {dimension_numbers = #tpu.dot_dimension_numbers<[1], [0], [0], [1], [0, 0, 1, 1], [], []>} : vector<8x32xbf16>, vector<32x128xbf16>, vector<8x128xf32> -> vector<8x128xf32>
    %c0_4 = arith.constant 0 : index
    %c0_5 = arith.constant 0 : index
    %8 = vector.load %arg4[%c0_4, %c0_5] : memref<1x128xf32, #tpu.memory_space<vmem>>, vector<1x128xf32>
    %9 = vector.broadcast %8 : vector<1x128xf32> to vector<8x128xf32>
    %10 = arith.addf %7, %9 : vector<8x128xf32>
    %11 = arith.truncf %10 : vector<8x128xf32> to vector<8x128xbf16>
    %c0_6 = arith.constant 0 : index
    %c0_7 = arith.constant 0 : index
    %12 = vector.load %arg8[%c0_6, %c0_7] : memref<8x128xbf16, #tpu.memory_space<vmem>>, vector<8x128xbf16>
    %cst_8 = arith.constant dense<0.000000e+00> : vector<8x8xf32>
    %13 = tpu.matmul %11, %12, %cst_8 {dimension_numbers = #tpu.dot_dimension_numbers<[1], [1], [0], [0], [0, 0, 1, 0], [], []>} : vector<8x128xbf16>, vector<8x128xbf16>, vector<8x8xf32> -> vector<8x8xf32>
    %cst_9 = arith.constant 1.000000e+00 : f32
    %14 = vector.broadcast %cst_9 : f32 to vector<8x8xf32>
    %15 = arith.mulf %13, %14 : vector<8x8xf32>
    %16 = tpu.iota {dimensions = array<i32: 0>} : vector<8x8xi32>
    %c8_i32 = arith.constant 8 : i32
    %17 = arith.muli %arg0, %c8_i32 : i32
    %18 = vector.broadcast %17 : i32 to vector<8x8xi32>
    %19 = arith.addi %16, %18 : vector<8x8xi32>
    %20 = tpu.iota {dimensions = array<i32: 1>} : vector<8x8xi32>
    %21 = arith.cmpi eq, %19, %20 : vector<8x8xi32>
    %cst_10 = arith.constant 0.000000e+00 : f32
    %22 = vector.broadcast %cst_10 : f32 to vector<8x8xf32>
    %23 = arith.select %21, %15, %22 : vector<8x8xi1>, vector<8x8xf32>
    %cst_11 = arith.constant dense<0.000000e+00> : vector<8xf32>
    %24 = vector.multi_reduction <add>, %23, %cst_11 [1] : vector<8x8xf32> to vector<8xf32>
    %25 = vector.shape_cast %24 : vector<8xf32> to vector<8x1xf32>
    %cst_12 = arith.constant dense<0xFF800000> : vector<8xf32>
    %26 = vector.multi_reduction <maximumf>, %15, %cst_12 [1] : vector<8x8xf32> to vector<8xf32>
    %27 = vector.shape_cast %26 : vector<8xf32> to vector<8x1xf32>
    %28 = vector.broadcast %27 : vector<8x1xf32> to vector<8x8xf32>
    %29 = arith.subf %15, %28 : vector<8x8xf32>
    %30 = math.exp %29 : vector<8x8xf32>
    %cst_13 = arith.constant dense<0.000000e+00> : vector<8xf32>
    %31 = vector.multi_reduction <add>, %30, %cst_13 [1] : vector<8x8xf32> to vector<8xf32>
    %32 = vector.shape_cast %31 : vector<8xf32> to vector<8x1xf32>
    %33 = math.log %32 : vector<8x1xf32>
    %34 = arith.addf %27, %33 : vector<8x1xf32>
    %c0_14 = arith.constant 0 : index
    %c0_15 = arith.constant 0 : index
    %35 = vector.load %arg11[%c0_14, %c0_15] : memref<1x1xf32, #tpu.memory_space<vmem>>, vector<1x1xf32>
    %36 = vector.shape_cast %34 : vector<8x1xf32> to vector<1x8x1xf32>
    %cst_16 = arith.constant dense<0.000000e+00> : vector<1xf32>
    %37 = vector.multi_reduction <add>, %36, %cst_16 [1, 2] : vector<1x8x1xf32> to vector<1xf32>
    %38 = vector.shape_cast %37 : vector<1xf32> to vector<1x1x1xf32>
    %39 = vector.extract %38[0, 0, 0] : f32 from vector<1x1x1xf32>
    %40 = vector.broadcast %39 : f32 to vector<1x1xf32>
    %41 = arith.addf %35, %40 : vector<1x1xf32>
    %c0_17 = arith.constant 0 : index
    %c0_18 = arith.constant 0 : index
    %42 = vector.load %arg11[%c0_17, %c0_18] : memref<1x1xf32, #tpu.memory_space<vmem>>, vector<1x1xf32>
    tpu.vector_store %arg11[%c0_17, %c0_18], %41 {strides = array<i32>} : memref<1x1xf32, #tpu.memory_space<vmem>>, vector<1x1xf32>,
    %c0_19 = arith.constant 0 : index
    %c0_20 = arith.constant 0 : index
    %43 = vector.load %arg12[%c0_19, %c0_20] : memref<1x1xf32, #tpu.memory_space<vmem>>, vector<1x1xf32>
    %44 = vector.shape_cast %25 : vector<8x1xf32> to vector<1x8x1xf32>
    %cst_21 = arith.constant dense<0.000000e+00> : vector<1xf32>
    %45 = vector.multi_reduction <add>, %44, %cst_21 [1, 2] : vector<1x8x1xf32> to vector<1xf32>
    %46 = vector.shape_cast %45 : vector<1xf32> to vector<1x1x1xf32>
    %47 = vector.extract %46[0, 0, 0] : f32 from vector<1x1x1xf32>
    %48 = vector.broadcast %47 : f32 to vector<1x1xf32>
    %49 = arith.addf %43, %48 : vector<1x1xf32>
    %c0_22 = arith.constant 0 : index
    %c0_23 = arith.constant 0 : index
    %50 = vector.load %arg12[%c0_22, %c0_23] : memref<1x1xf32, #tpu.memory_space<vmem>>, vector<1x1xf32>
    tpu.vector_store %arg12[%c0_22, %c0_23], %49 {strides = array<i32>} : memref<1x1xf32, #tpu.memory_space<vmem>>, vector<1x1xf32>,
    %cst_24 = arith.constant dense<0xFF800000> : vector<8xf32>
    %51 = vector.multi_reduction <maximumf>, %15, %cst_24 [0] : vector<8x8xf32> to vector<8xf32>
    %52 = vector.shape_cast %51 : vector<8xf32> to vector<1x8xf32>
    %c0_25 = arith.constant 0 : index
    %c0_26 = arith.constant 0 : index
    %53 = vector.load %arg9[%c0_25, %c0_26] : memref<1x8xf32, #tpu.memory_space<vmem>>, vector<1x8xf32>
    %54 = arith.maximumf %53, %52 : vector<1x8xf32>
    %c0_27 = arith.constant 0 : index
    %c0_28 = arith.constant 0 : index
    %55 = vector.load %arg10[%c0_27, %c0_28] : memref<1x8xf32, #tpu.memory_space<vmem>>, vector<1x8xf32>
    %c0_29 = arith.constant 0 : index
    %c0_30 = arith.constant 0 : index
    %56 = vector.load %arg9[%c0_29, %c0_30] : memref<1x8xf32, #tpu.memory_space<vmem>>, vector<1x8xf32>
    %57 = arith.subf %56, %54 : vector<1x8xf32>
    %58 = math.exp %57 : vector<1x8xf32>
    %59 = arith.mulf %55, %58 : vector<1x8xf32>
    %60 = vector.broadcast %54 : vector<1x8xf32> to vector<8x8xf32>
    %61 = arith.subf %15, %60 : vector<8x8xf32>
    %62 = math.exp %61 : vector<8x8xf32>
    %cst_31 = arith.constant dense<0.000000e+00> : vector<8xf32>
    %63 = vector.multi_reduction <add>, %62, %cst_31 [0] : vector<8x8xf32> to vector<8xf32>
    %64 = vector.shape_cast %63 : vector<8xf32> to vector<1x8xf32>
    %65 = arith.addf %59, %64 : vector<1x8xf32>
    %c0_32 = arith.constant 0 : index
    %c0_33 = arith.constant 0 : index
    %66 = vector.load %arg10[%c0_32, %c0_33] : memref<1x8xf32, #tpu.memory_space<vmem>>, vector<1x8xf32>
    tpu.vector_store %arg10[%c0_32, %c0_33], %65 {strides = array<i32>} : memref<1x8xf32, #tpu.memory_space<vmem>>, vector<1x8xf32>,
    %c0_34 = arith.constant 0 : index
    %c0_35 = arith.constant 0 : index
    %67 = vector.load %arg9[%c0_34, %c0_35] : memref<1x8xf32, #tpu.memory_space<vmem>>, vector<1x8xf32>
    tpu.vector_store %arg9[%c0_34, %c0_35], %54 {strides = array<i32>} : memref<1x8xf32, #tpu.memory_space<vmem>>, vector<1x8xf32>,
    %c0_i32_36 = arith.constant 0 : i32
    %68 = arith.cmpi eq, %arg0, %c0_i32_36 : i32
    %69 = arith.extui %68 : i1 to i32
    %c0_i32_37 = arith.constant 0 : i32
    %70 = arith.cmpi ne, %69, %c0_i32_37 : i32
    scf.if %70 {
      %c0_38 = arith.constant 0 : index
      %c0_39 = arith.constant 0 : index
      %71 = vector.load %arg9[%c0_38, %c0_39] : memref<1x8xf32, #tpu.memory_space<vmem>>, vector<1x8xf32>
      %c0_40 = arith.constant 0 : index
      %c0_41 = arith.constant 0 : index
      %72 = vector.load %arg10[%c0_40, %c0_41] : memref<1x8xf32, #tpu.memory_space<vmem>>, vector<1x8xf32>
      %73 = math.log %72 : vector<1x8xf32>
      %74 = arith.addf %71, %73 : vector<1x8xf32>
      %75 = vector.shape_cast %74 : vector<1x8xf32> to vector<1x1x8xf32>
      %cst_42 = arith.constant dense<0.000000e+00> : vector<1xf32>
      %76 = vector.multi_reduction <add>, %75, %cst_42 [1, 2] : vector<1x1x8xf32> to vector<1xf32>
      %77 = vector.shape_cast %76 : vector<1xf32> to vector<1x1x1xf32>
      %78 = vector.extract %77[0, 0, 0] : f32 from vector<1x1x1xf32>
      %79 = vector.broadcast %78 : f32 to vector<1x1xf32>
      %c0_43 = arith.constant 0 : index
      %c0_44 = arith.constant 0 : index
      %80 = vector.load %arg11[%c0_43, %c0_44] : memref<1x1xf32, #tpu.memory_space<vmem>>, vector<1x1xf32>
      %c0_45 = arith.constant 0 : index
      %c0_46 = arith.constant 0 : index
      %81 = vector.load %arg12[%c0_45, %c0_46] : memref<1x1xf32, #tpu.memory_space<vmem>>, vector<1x1xf32>
      %82 = arith.subf %80, %81 : vector<1x1xf32>
      %c0_47 = arith.constant 0 : index
      %c0_48 = arith.constant 0 : index
      %83 = vector.load %arg12[%c0_47, %c0_48] : memref<1x1xf32, #tpu.memory_space<vmem>>, vector<1x1xf32>
      %84 = arith.subf %79, %83 : vector<1x1xf32>
      %85 = arith.addf %82, %84 : vector<1x1xf32>
      %cst_49 = arith.constant 5.000000e-01 : f32
      %86 = vector.broadcast %cst_49 : f32 to vector<1x1xf32>
      %87 = arith.mulf %86, %85 : vector<1x1xf32>
      %cst_50 = arith.constant 1.250000e-01 : f32
      %88 = vector.broadcast %cst_50 : f32 to vector<1x1xf32>
      %89 = arith.mulf %87, %88 : vector<1x1xf32>
      %c0_51 = arith.constant 0 : index
      %c0_52 = arith.constant 0 : index
      %90 = vector.load %arg7[%c0_51, %c0_52] : memref<1x1xf32, #tpu.memory_space<vmem>>, vector<1x1xf32>
      tpu.vector_store %arg7[%c0_51, %c0_52], %89 {strides = array<i32>} : memref<1x1xf32, #tpu.memory_space<vmem>>, vector<1x1xf32>,
    } else {
    }
    return
  }
  func.func @transform_0(%arg0: i32) -> (i32, i32) {
    %c0_i32 = arith.constant 0 : i32
    %c0_i32_0 = arith.constant 0 : i32
    return %arg0, %c0_i32 : i32, i32
  }
  func.func @transform_1(%arg0: i32) -> (i32, i32) {
    %c0_i32 = arith.constant 0 : i32
    %c0_i32_0 = arith.constant 0 : i32
    %c0_i32_1 = arith.constant 0 : i32
    return %c0_i32, %c0_i32_0 : i32, i32
  }
  func.func @transform_2(%arg0: i32) -> (i32, i32) {
    %c0_i32 = arith.constant 0 : i32
    %c0_i32_0 = arith.constant 0 : i32
    %c0_i32_1 = arith.constant 0 : i32
    return %c0_i32, %c0_i32_0 : i32, i32
  }
  func.func @transform_3(%arg0: i32) -> (i32, i32) {
    %c0_i32 = arith.constant 0 : i32
    %c0_i32_0 = arith.constant 0 : i32
    %c0_i32_1 = arith.constant 0 : i32
    return %c0_i32, %c0_i32_0 : i32, i32
  }
  func.func @transform_4(%arg0: i32) -> (i32, i32) {
    %c0_i32 = arith.constant 0 : i32
    %c0_i32_0 = arith.constant 0 : i32
    %c0_i32_1 = arith.constant 0 : i32
    return %c0_i32, %c0_i32_0 : i32, i32
  }
  func.func @transform_5(%arg0: i32) -> (i32, i32) {
    %c0_i32 = arith.constant 0 : i32
    %c0_i32_0 = arith.constant 0 : i32
    %c0_i32_1 = arith.constant 0 : i32
    return %c0_i32, %c0_i32_0 : i32, i32
  }
  func.func @transform_6(%arg0: i32) -> (i32, i32) {
    %c0_i32 = arith.constant 0 : i32
    %c0_i32_0 = arith.constant 0 : i32
    %c0_i32_1 = arith.constant 0 : i32
    return %c0_i32, %c0_i32_0 : i32, i32
  }
}

</mosaic_0001>

<bundles_post_ra>
// kernel: tpu_custom_call.1
= control target key start
LH: loop header
LB: loop body
LE: loop exit
PB: predicated region body
PF: predicated region fallthrough
CT: control target
= control target key end

     0   :  { %11 = vsyncpa [#allocation8], 0  ;;  %s541_s0 = inlined_call_operand.hbm [shape: f32[8,32], index: 0, kind: input, shape index: {}]   ;;  %s542_s1 = inlined_call_operand.hbm [shape: f32[8,32], index: 1, kind: input, shape index: {}]   ;;  %s543_s2 = inlined_call_operand.hbm [shape: f32[32,128], index: 2, kind: input, shape index: {}]   ;;  %s544_s3 = inlined_call_operand.vmem [shape: f32[1,128], index: 3, kind: input, shape index: {}]   ;;  %s545_s4 = inlined_call_operand.hbm [shape: f32[32,128], index: 4, kind: input, shape index: {}]   ;;  %s546_s5 = inlined_call_operand.vmem [shape: f32[1,128], index: 5, kind: input, shape index: {}]   ;;  %s547_s6 = inlined_call_operand.hbm [shape: f32[1,1], index: 6, kind: output, shape index: {}]  }
   0x1   :  { %12 = vsyncpa [#allocation11], 0 }
   0x2   :  { %13 = vsyncpa [#allocation14], 0  ;;  %s31_s23 = sshll.u32 %s542_s1, 4  ;;  %s32_s23 = int_to_ptr.hbm [resolvable:$true] %s31_s23 }
   0x3   :  { %14 = vsyncpa [#allocation9], 0  ;;  %s457_s24 = smov [#allocation10]   ;;  %s20_s28 = sshll.u32 %s541_s0, 4  ;;  %s21_s28 = int_to_ptr.hbm [resolvable:$true] %s20_s28 }
   0x4   :  { %s33_s25 = sshll.u32 %s457_s24, 4  ;;  %s458_s29 = smov [#allocation7]   ;;  %s34_s25 = int_to_ptr.vmem [resolvable:$true] %s33_s25 }
   0x5   :  { %36 = dma.hbm_to_vmem [thread:$0]  %s32_s23, 128, %s34_s25, [#allocation11]  }
   0x6   :  { %s22_s30 = sshll.u32 %s458_s29, 4  ;;  %s41_s9 = sshll.u32 %s543_s2, 4  ;;  %s23_s30 = int_to_ptr.vmem [resolvable:$true] %s22_s30  ;;  %s42_s9 = int_to_ptr.hbm [resolvable:$true] %s41_s9 }
   0x7   :  { %25 = dma.hbm_to_vmem [thread:$0]  %s21_s28, 128, %s23_s30, [#allocation8]  }
   0x8   :  { %s459_s1 = smov [#allocation12]   ;;  %s56_s13 = sshll.u32 %s545_s4, 4  ;;  %s57_s13 = int_to_ptr.hbm [resolvable:$true] %s56_s13 }
   0x9   :  { %s43_s10 = sshll.u32 %s459_s1, 4  ;;  %s460_s14 = smov 128   ;;  %s44_s10 = int_to_ptr.vmem [resolvable:$true] %s43_s10 }
   0xa   :  { %s461_s0 = smov 8   ;;  %s462_s15 = smov [#allocation13]  }
   0xb   :  { %49 = dma.hbm_to_vmem [thread:$0]  %s42_s9, 512, %s44_s10, [#allocation11], %s460_s14, %s460_s14, %s461_s0  }
   0xc   :  { %s58_s16 = sshll.u32 %s462_s15, 4  ;;  %s59_s16 = int_to_ptr.vmem [resolvable:$true] %s58_s16 }
   0xd   :  { %64 = dma.hbm_to_vmem [thread:$0]  %s57_s13, 512, %s59_s16, [#allocation14], %s460_s14, %s460_s14, %s461_s0  }
   0xe   :  { %449 = dma.done.wait [#allocation8], 128  }
   0xf   :  { %450 = vsyncadd [#allocation8], 4294967168 }
  0x10   :  { %451 = dma.done.wait [#allocation11], 640  }
  0x11   :  { %452 = vsyncadd [#allocation11], 4294966656 }
  0x12   :  { %453 = dma.done.wait [#allocation14], 512  }
  0x13   :  { %454 = vsyncadd [#allocation14], 4294966784  ;;  %v92_v0 = vld [vmem:[#allocation13 + $0x10] sm:$0xff]  ;;  %v93_v1 = vld [vmem:[#allocation13 + $0x18] sm:$0xff]  ;;  %vm100_vm0 = vcmask 261120   ;;  %vm119_vm1 = vcmask 57344   ;;  %v169_v29 = vlaneseq }
  0x14   :  { %v90_v2 = vld [vmem:[#allocation13] sm:$0xff]  ;;  %v95_v3 = vpack.c.bf16 %v93_v1, %v92_v0  ;;  %v91_v4 = vld [vmem:[#allocation13 + $0x8] sm:$0xff]  ;;  %v129_v5 = vld [vmem:[#allocation12 + $0x10] sm:$0xff]  ;;  %v463_v27 = vmov -inf   ;;  %v464_v28 = vmov 0.0   ;;  %vm178_vm2 = vcmask 64512  }
  0x15   :  { %v130_v6 = vld [vmem:[#allocation12 + $0x18] sm:$0xff]  ;;  %v127_v7 = vld [vmem:[#allocation12] sm:$0xff]  ;;  %v128_v8 = vld [vmem:[#allocation12 + $0x8] sm:$0xff]  ;;  %v94_v9 = vpack.c.bf16 %v91_v4, %v90_v2  ;;  %120 = vst.msk [vmem:[#allocation3] sm:$0x1] %vm119_vm1, %v463_v27  ;;  %v170_v30 = vshrl.u32 %v169_v29, 7 }
  0x16   :  { %110 = vmatpush.bf16.msra.mxu0 %v95_v3  ;;  %v88_v10 = vld [vmem:[#allocation10] sm:$0xff]  ;;  %v132_v11 = vpack.c.bf16 %v130_v6, %v129_v5  ;;  %v131_v12 = vpack.c.bf16 %v128_v8, %v127_v7  ;;  %v125_v13 = vld [vmem:[#allocation7] sm:$0xff]  ;;  %v317_v16 = vld [vmem:[%s546_s5] ss:$0 sm:$0xff]  ;;  %121 = vst.msk [vmem:[#allocation4] sm:$0x1] %vm119_vm1, %v464_v28 }
  0x17   :  { %v89_v14 = vpack.c.bf16 %v88_v10, %v88_v10  ;;  %v126_v15 = vpack.c.bf16 %v125_v13, %v125_v13  ;;  %v318_v21 = vld [vmem:[%s544_s3] ss:$0 sm:$0xff]  ;;  %v175_v31 = vand.u32 127, %v169_v29  ;;  %vm195_vm4 = vcmask 7168   ;;  %s465_s20 = smov [#allocation15]   ;;  %s288_s24 = sshll.u32 %s547_s6, 4  ;;  %s289_s24 = int_to_ptr.hbm [resolvable:$true] %s288_s24 }
  0x18   :  { %147 = vmatpush.bf16.msra.mxu1 %v132_v11  ;;  %vm122_vm5 = vcmask 0   ;;  %s286_s21 = sshll.u32 %s465_s20, 4  ;;  %s287_s21 = int_to_ptr.vmem [resolvable:$true] %s286_s21 }
  0x19   :  { %vm176_vm3 = vcmp.eq.s32.totalorder %v170_v30, %v175_v31  ;;  %123 = vst.msk [vmem:[#allocation5] sm:$0x1] %vm122_vm5, %v464_v28 }
  0x1a   :  { %111 = vmatpush.bf16.msra.mxu0 %v94_v9  ;;  %124 = vst.msk [vmem:[#allocation6] sm:$0x1] %vm122_vm5, %v464_v28 }
  0x1c   :  { %148 = vmatpush.bf16.msra.mxu1 %v131_v12  ;;  %v230_v42 = vld [vmem:[#allocation3] sm:$0x1] }
  0x1d   :  { %300 = vmatmul.msk.bf16.vlgmr.msra.gmra.mxu0 %vm100_vm0, %v89_v14  ;;  %v232_v57 = vld [vmem:[#allocation4] sm:$0x1] }
  0x1f   :  { %301 = vmatmul.msk.bf16.vlgmr.msra.gmra.mxu1 %vm100_vm0, %v126_v15 }
  0x9a   :  { %v113_v17 = vpop.f32.mrf.mxu0 }
  0x9b   :  { %v114_v18 = vadd.f32 %v317_v16, %v113_v17 }
  0x9c   :  { %v150_v19 = vpop.f32.mrf.mxu1 }
  0x9d   :  { %v117_v20 = vpack.c.bf16 %v114_v18, %v114_v18  ;;  %v151_v24 = vadd.f32 %v318_v21, %v150_v19 }
  0x9f   :  { %118 = vst [vmem:[#allocation2] sm:$0xf] %v117_v20  ;;  %v154_v26 = vpack.c.bf16 %v151_v24, %v151_v24 }
  0xa2   :  { %v115_v22 = vpop.f32.mrf.mxu0 }
  0xa4   :  { %v152_v23 = vpop.f32.mrf.mxu1 }
  0xa6   :  { %v155_v25 = vld [vmem:[#allocation2] sm:$0xf] }
  0xa7   :  { %163 = vmatpush.bf16.xpose.msra.mxu2 %v155_v25 }
  0xae   :  { %164 = vmatmul.bf16.vlgmr.msra.gmra.mxu2 %v154_v26 }
 0x131   :  { %v165_v32 = vpop.f32.mrf.mxu2 }
 0x132   :  { %v182_v33 = vsel %vm178_vm2, %v165_v32, -inf  ;;  %v177_v34 = vsel %vm176_vm3, %v165_v32, 0.0 }
 0x133   :  { %183 = vmax.xlane.f32.xlu0 %v182_v33  ;;  %v224_v35 = vrot.slane %v182_v33, 4  ;;  %v179_v36 = vsel %vm178_vm2, %v177_v34, 0.0 }
 0x134   :  { %180 = vadd.xlane.f32.xlu1 %v179_v36 }
 0x135   :  { %v225_v37 = vmax.f32 %v182_v33, %v224_v35 }
 0x137   :  { %v226_v38 = vrot.slane %v225_v37, 2 }
 0x139   :  { %v227_v39 = vmax.f32 %v225_v37, %v226_v38  ;;  %v167_v40 = vpop.f32.mrf.mxu2  ;;  %v194_v37 = vld [vmem:[#allocation5] sm:$0x1]  ;;  %v210_v38 = vld [vmem:[#allocation6] sm:$0x1] }
 0x13b   :  { %v228_v41 = vrot.slane %v227_v39, 1 }
 0x13d   :  { %v229_v43 = vmax.f32 %v227_v39, %v228_v41 }
 0x13f   :  { %v231_v44 = vmax.f32 %v230_v42, %v229_v43 }
 0x141   :  { %v238_v45 = vperm.slane %v231_v44, 0  ;;  %253 = vst.msk [vmem:[#allocation3] sm:$0x1] %vm119_vm1, %v231_v44  ;;  %v233_v48 = vsub.f32 %v230_v42, %v231_v44 }
 0x143   :  { %v240_v46 = vsub.f32 %v165_v32, %v238_v45  ;;  %v234_v49 = vmul.f32 1.442695, %v233_v48 }
 0x145   :  { %v241_v47 = vmul.f32 1.442695, %v240_v46 }
 0x147   :  { %319 = vpow2.f32 %v241_v47 }
 0x148   :  { %321 = vpow2.f32 %v234_v49  ;;  %v257_v6 = vld [vmem:[#allocation3] sm:$0x1] }
 0x14d   :  { %v320_v50 = vpop.eup %319 }
 0x14e   :  { %v243_v51 = vsel %vm178_vm2, %v320_v50, 0.0  ;;  %v322_v56 = vpop.eup %321 }
 0x14f   :  { %v244_v52 = vrot.slane %v243_v51, 4  ;;  %v236_v59 = vmul.f32 %v322_v56, %v232_v57 }
 0x151   :  { %v245_v53 = vadd.f32 %v244_v52, %v243_v51 }
 0x153   :  { %v246_v54 = vrot.slane %v245_v53, 2 }
 0x155   :  { %v247_v55 = vadd.f32 %v246_v54, %v245_v53 }
 0x157   :  { %v248_v58 = vrot.slane %v247_v55, 1 }
 0x159   :  { %v249_v60 = vadd.f32 %v248_v58, %v247_v55 }
 0x15b   :  { %v250_v61 = vadd.f32 %v249_v60, %v236_v59 }
 0x15d   :  { %252 = vst.msk [vmem:[#allocation4] sm:$0x1] %vm119_vm1, %v250_v61 }
 0x164   :  { %v258_v62 = vld [vmem:[#allocation4] sm:$0x1] }
 0x165   :  { %323 = vlog2.f32 %v258_v62 }
 0x16b   :  { %v324_v63 = vpop.eup %323 }
 0x16c   :  { %v260_v4 = vmul.f32 0.6931472, %v324_v63 }
 0x16e   :  { %v261_v7 = vadd.f32 %v260_v4, %v257_v6 }
 0x170   :  { %v262_v8 = vsel %vm119_vm1, %v261_v7, 0.0 }
 0x1a6   :  { %v184_v0 = vpop.xlane.xlu0 %183 }
 0x1a7   :  { %v185_v1 = vsub.f32 %v165_v32, %v184_v0  ;;  %v181_v2 = vpop.xlane.xlu1 %180 }
 0x1a8   :  { %v211_v3 = vsel %vm195_vm4, %v181_v2, 0.0 }
 0x1a9   :  { %v186_v5 = vmul.f32 1.442695, %v185_v1  ;;  %212 = vadd.xlane.f32.xlu2 %v211_v3 }
 0x1ab   :  { %325 = vpow2.f32 %v186_v5 }
 0x1b1   :  { %v326_v9 = vpop.eup %325  ;;  %263 = vadd.xlane.f32.xlu2 %v262_v8 }
 0x1b2   :  { %v188_v10 = vsel %vm178_vm2, %v326_v9, 0.0 }
 0x1b3   :  { %189 = vadd.xlane.f32.xlu0 %v188_v10 }
 0x21c   :  { %v213_v16 = vpop.xlane.xlu2 %212 }
 0x21d   :  { %v214_v18 = vrot.slane %v213_v16, 4 }
 0x21f   :  { %v215_v20 = vadd.f32 %v214_v18, %v213_v16 }
 0x221   :  { %v216_v22 = vrot.slane %v215_v20, 2 }
 0x223   :  { %v217_v27 = vadd.f32 %v216_v22, %v215_v20 }
 0x224   :  { %v264_v17 = vpop.xlane.xlu2 %263 }
 0x225   :  { %v265_v19 = vrot.slane %v264_v17, 4  ;;  %v218_v32 = vrot.slane %v217_v27, 1 }
 0x226   :  { %v190_v11 = vpop.xlane.xlu0 %189 }
 0x227   :  { %327 = vlog2.f32 %v190_v11  ;;  %v266_v21 = vadd.f32 %v265_v19, %v264_v17  ;;  %v219_v36 = vadd.f32 %v218_v32, %v217_v27 }
 0x229   :  { %v267_v24 = vrot.slane %v266_v21, 2 }
 0x22b   :  { %v268_v29 = vadd.f32 %v267_v24, %v266_v21 }
 0x22d   :  { %v328_v12 = vpop.eup %327  ;;  %v269_v34 = vrot.slane %v268_v29, 1 }
 0x22e   :  { %v192_v13 = vmul.f32 0.6931472, %v328_v12 }
 0x22f   :  { %v270_v28 = vadd.f32 %v269_v34, %v268_v29 }
 0x230   :  { %v193_v14 = vadd.f32 %v192_v13, %v184_v0 }
 0x232   :  { %v196_v15 = vsel %vm195_vm4, %v193_v14, 0.0 }
 0x233   :  { %197 = vadd.xlane.f32.xlu1 %v196_v15 }
 0x2a6   :  { %v198_v23 = vpop.xlane.xlu1 %197 }
 0x2a7   :  { %v199_v25 = vrot.slane %v198_v23, 4 }
 0x2a9   :  { %v200_v26 = vadd.f32 %v199_v25, %v198_v23 }
 0x2ab   :  { %v201_v30 = vrot.slane %v200_v26, 2 }
 0x2ad   :  { %v202_v31 = vadd.f32 %v201_v30, %v200_v26 }
 0x2af   :  { %v203_v33 = vrot.slane %v202_v31, 1 }
 0x2b1   :  { %v204_v35 = vadd.f32 %v203_v33, %v202_v31 }
 0x2b3   :  { %302 = vpush %v204_v35 }
 0x2b4   :  { %304 = vpush %v219_v36 }
 0x2b5   :  { %306 = vpush %v270_v28 }
 0x2e4   :  { %s303_s3 = spop %302 }
 0x2e5   :  { %v206_v39 = vstv %s303_s3  ;;  %s305_s5 = spop %304 }
 0x2e6   :  { %v207_v40 = vadd.f32 %v206_v39, %v194_v37  ;;  %v221_v41 = vstv %s305_s5  ;;  %s307_s19 = spop %306 }
 0x2e7   :  { %v222_v42 = vadd.f32 %v221_v41, %v210_v38  ;;  %v272_v44 = vstv %s307_s19 }
 0x2e8   :  { %209 = vst.msk [vmem:[#allocation5] sm:$0x1] %vm122_vm5, %v207_v40 }
 0x2e9   :  { %223 = vst.msk [vmem:[#allocation6] sm:$0x1] %vm122_vm5, %v222_v42 }
 0x2ef   :  { %v273_v43 = vld [vmem:[#allocation5] sm:$0x1] }
 0x2f0   :  { %v274_v45 = vld [vmem:[#allocation6] sm:$0x1] }
 0x2f1   :  { %v275_v46 = vsub.f32 %v273_v43, %v274_v45  ;;  %v276_v47 = vsub.f32 %v272_v44, %v274_v45 }
 0x2f3   :  { %v277_v48 = vadd.f32 %v276_v47, %v275_v46 }
 0x2f5   :  { %v278_v49 = vmul.f32 0.5, %v277_v48 }
 0x2f7   :  { %v279_v50 = vmul.f32 0.125, %v278_v49 }
 0x2f9   :  { %280 = vst.msk [vmem:[#allocation15] sm:$0x1] %vm122_vm5, %v279_v50 }
 0x2fa   :  { %291 = dma.vmem_to_hbm [thread:$0]  %s287_s21, 16, %s289_s24, [#allocation9]  }
 0x2fb   :  { %455 = dma.done.wait [#allocation9], 16  }
 0x2fc   :  { %456 = vsyncadd [#allocation9], 4294967280 }
 0x2fd   :  { %296 = vsyncpa [#allocation8], 1 }
 0x2fe   :  { %297 = vsyncpa [#allocation11], 1 }
 0x2ff   :  { %298 = vsyncpa [#allocation14], 1 }
 0x300   :  { %299 = vsyncpa [#allocation9], 1 }

</bundles_post_ra>
